<compile_context>
chip_gen: v6e
topology: v6e:2x2x1
jax: 0.10.0
libtpu: 0.0.40
codegen_flags: <defaults>
</compile_context>

<pallas_src>
import jax
import jax.numpy as jnp
from jax.experimental import pallas as pl
from jax.experimental.pallas import tpu as pltpu

N = 16            # number of graph nodes
IN_FEATS = 32
OUT_FEATS = 32    # == IN_FEATS so the 4 layers compose (as the module uses them)
NUM_LAYERS = 4

_W_ROWS = NUM_LAYERS * IN_FEATS   # 128 weight rows in the packed parameter slab
_B_PAD_ROWS = 8                   # bias block padded to a full sublane group
PARAM_ROWS = _W_ROWS + _B_PAD_ROWS  # 136 (multiple of 8)


def gnn_fused_kernel(feat_ref, adj_ref, params_ref, out_ref):
    """All NUM_LAYERS GraphConv layers, fully resident in VMEM, no grid."""
    adj = adj_ref[...]                                        # (N_src, N_dst)

    # --- graph-invariant normalization (once per model; XLU + EUP slots) ---
    out_deg = jnp.sum(adj, axis=1, keepdims=True)             # (N, 1) src out-degree
    in_deg = jnp.sum(adj, axis=0, keepdims=True)              # (1, N) dst in-degree
    norm_src = jax.lax.rsqrt(jnp.maximum(out_deg, 1.0))       # deg^{-1/2}, clamp(min=1)
    norm_dst = jax.lax.rsqrt(jnp.maximum(in_deg, 1.0))
    a_norm = adj * norm_src * norm_dst                        # D_s^{-1/2} A D_d^{-1/2}

    h = feat_ref[...].astype(jnp.float32)                     # (N, F)

    # Static unroll over the 4 layers; per-layer slices of the packed slab are
    # static & sublane-aligned (offsets 0/32/64/96 for W, rows 128..131 for b).
    for layer in range(NUM_LAYERS):
        w = params_ref[pl.ds(layer * IN_FEATS, IN_FEATS), :]  # (F, F)
        b = params_ref[pl.ds(_W_ROWS + layer, 1), :]          # (1, F)

        z = jnp.dot(h, w, preferred_element_type=jnp.float32)  # (N, F) on MXU

        # agg[j, :] = sum_i a_norm[i, j] * z[i, :]  (contract the src axis)
        agg = jax.lax.dot_general(a_norm, z, (((0,), (0,)), ((), ())),
                                  preferred_element_type=jnp.float32)  # (N, F)
        h = agg + b

    # (N, OUT_FEATS)=(16,32): 32/128 lanes -> masked store; accepted (2 KiB).
    out_ref[...] = h.astype(out_ref.dtype)


@jax.jit
def gnn_model_forward(feat, adj, w_stack, b_stack):
    n, f = feat.shape

    # Pack all parameters into one lane/sublane-friendly slab -> single DMA.
    w_slab = w_stack.astype(jnp.float32).reshape(NUM_LAYERS * f, f)     # (128, F)
    b_slab = jnp.zeros((_B_PAD_ROWS, f), jnp.float32)
    b_slab = b_slab.at[:NUM_LAYERS].set(b_stack.astype(jnp.float32))    # (8, F)
    params = jnp.concatenate([w_slab, b_slab], axis=0)                  # (136, F)

    return pl.pallas_call(
        gnn_fused_kernel,
        out_shape=jax.ShapeDtypeStruct((n, OUT_FEATS), jnp.float32),
        in_specs=[
            pl.BlockSpec(memory_space=pltpu.MemorySpace.VMEM),   # feat
            pl.BlockSpec(memory_space=pltpu.MemorySpace.VMEM),   # adj
            pl.BlockSpec(memory_space=pltpu.MemorySpace.VMEM),   # packed params
        ],
        out_specs=pl.BlockSpec(memory_space=pltpu.MemorySpace.VMEM),
    )(feat, adj, params)


# ------------------------- pure-JAX reference ---------------------------- #
def gnn_model_reference(feat, adj, w_stack, b_stack):
    out_deg = jnp.maximum(jnp.sum(adj, axis=1), 1.0)
    in_deg = jnp.maximum(jnp.sum(adj, axis=0), 1.0)
    ns = out_deg ** -0.5                                       # (N,)
    nd = in_deg ** -0.5                                        # (N,)
    h = feat
    for layer in range(NUM_LAYERS):
        z = (h * ns[:, None]) @ w_stack[layer]                 # src-normalized proj
        agg = adj.T @ z                                        # sum over in-edges
        h = agg * nd[:, None] + b_stack[layer][None, :]        # dst norm + bias
    return h


# --------------------------- deterministic init --------------------------- #
def init_params(key):
    ws, bs = [], []
    for _ in range(NUM_LAYERS):
        key, kw, kb = jax.random.split(key, 3)
        limit = jnp.sqrt(6.0 / (IN_FEATS + OUT_FEATS))         # xavier_uniform
        ws.append(jax.random.uniform(kw, (IN_FEATS, OUT_FEATS),
                                     minval=-limit, maxval=limit,
                                     dtype=jnp.float32))
        # DGL zero-inits bias; use small random values so the bias path is tested.
        bs.append(0.01 * jax.random.normal(kb, (OUT_FEATS,), dtype=jnp.float32))
    return jnp.stack(ws), jnp.stack(bs)                        # (L,F,F), (L,F)


if __name__ == "__main__":
    key = jax.random.PRNGKey(0)
    key, kfeat, kadj, kparam = jax.random.split(key, 4)

    feat = jax.random.normal(kfeat, (N, IN_FEATS), dtype=jnp.float32)

    # Deterministic random graph + self loops; adj[src, dst].
    adj = (jax.random.uniform(kadj, (N, N)) < 0.3).astype(jnp.float32)
    adj = jnp.maximum(adj, jnp.eye(N, dtype=jnp.float32))

    w_stack, b_stack = init_params(kparam)

    out = gnn_model_forward(feat, adj, w_stack, b_stack)
    out = jax.block_until_ready(out)

    ref = gnn_model_reference(feat, adj, w_stack, b_stack)
    assert out.shape == (N, OUT_FEATS)
    assert jnp.allclose(out, ref, atol=1e-2, rtol=1e-2), "mismatch vs reference"

    print("KERNEL_OK")
</pallas_src>

<mosaic_0001>
module attributes {stable_mosaic.version = 11 : i64} {
  func.func @gnn_fused_kernel(%arg0: memref<16x32xf32, #tpu.memory_space<vmem>>, %arg1: memref<16x16xf32, #tpu.memory_space<vmem>>, %arg2: memref<136x32xf32, #tpu.memory_space<vmem>>, %arg3: memref<16x32xf32, #tpu.memory_space<vmem>>) attributes {dimension_semantics = [], scalar_prefetch = 0 : i64, scratch_operands = 0 : i64, tpu.core_type = #tpu.core_type<tc>} {
    %c0 = arith.constant 0 : index
    %c0_0 = arith.constant 0 : index
    %0 = vector.load %arg1[%c0, %c0_0] : memref<16x16xf32, #tpu.memory_space<vmem>>, vector<16x16xf32>
    %cst = arith.constant dense<0.000000e+00> : vector<16xf32>
    %1 = vector.multi_reduction <add>, %0, %cst [1] : vector<16x16xf32> to vector<16xf32>
    %2 = vector.shape_cast %1 : vector<16xf32> to vector<16x1xf32>
    %cst_1 = arith.constant dense<0.000000e+00> : vector<16xf32>
    %3 = vector.multi_reduction <add>, %0, %cst_1 [0] : vector<16x16xf32> to vector<16xf32>
    %4 = vector.shape_cast %3 : vector<16xf32> to vector<1x16xf32>
    %cst_2 = arith.constant 1.000000e+00 : f32
    %5 = vector.broadcast %cst_2 : f32 to vector<16x1xf32>
    %6 = arith.maximumf %2, %5 : vector<16x1xf32>
    %7 = math.rsqrt %6 : vector<16x1xf32>
    %cst_3 = arith.constant 1.000000e+00 : f32
    %8 = vector.broadcast %cst_3 : f32 to vector<1x16xf32>
    %9 = arith.maximumf %4, %8 : vector<1x16xf32>
    %10 = math.rsqrt %9 : vector<1x16xf32>
    %11 = vector.broadcast %7 : vector<16x1xf32> to vector<16x16xf32>
    %12 = arith.mulf %0, %11 : vector<16x16xf32>
    %13 = vector.broadcast %10 : vector<1x16xf32> to vector<16x16xf32>
    %14 = arith.mulf %12, %13 : vector<16x16xf32>
    %c0_4 = arith.constant 0 : index
    %c0_5 = arith.constant 0 : index
    %15 = vector.load %arg0[%c0_4, %c0_5] : memref<16x32xf32, #tpu.memory_space<vmem>>, vector<16x32xf32>
    %c0_6 = arith.constant 0 : index
    %c0_7 = arith.constant 0 : index
    %16 = vector.load %arg2[%c0_6, %c0_7] : memref<136x32xf32, #tpu.memory_space<vmem>>, vector<32x32xf32>
    %c128 = arith.constant 128 : index
    %c0_8 = arith.constant 0 : index
    %17 = vector.load %arg2[%c128, %c0_8] : memref<136x32xf32, #tpu.memory_space<vmem>>, vector<1x32xf32>
    %cst_9 = arith.constant dense<0.000000e+00> : vector<16x32xf32>
    %18 = tpu.matmul %15, %16, %cst_9 {dimension_numbers = #tpu.dot_dimension_numbers<[1], [0], [0], [1], [0, 0, 1, 1], [], []>} : vector<16x32xf32>, vector<32x32xf32>, vector<16x32xf32> -> vector<16x32xf32>
    %cst_10 = arith.constant dense<0.000000e+00> : vector<16x32xf32>
    %19 = tpu.matmul %14, %18, %cst_10 {dimension_numbers = #tpu.dot_dimension_numbers<[0], [0], [1], [1], [0, 1, 1, 1], [], []>} : vector<16x16xf32>, vector<16x32xf32>, vector<16x32xf32> -> vector<16x32xf32>
    %20 = vector.broadcast %17 : vector<1x32xf32> to vector<16x32xf32>
    %21 = arith.addf %19, %20 : vector<16x32xf32>
    %c32 = arith.constant 32 : index
    %c0_11 = arith.constant 0 : index
    %22 = vector.load %arg2[%c32, %c0_11] : memref<136x32xf32, #tpu.memory_space<vmem>>, vector<32x32xf32>
    %c129 = arith.constant 129 : index
    %c0_12 = arith.constant 0 : index
    %23 = vector.load %arg2[%c129, %c0_12] : memref<136x32xf32, #tpu.memory_space<vmem>>, vector<1x32xf32>
    %cst_13 = arith.constant dense<0.000000e+00> : vector<16x32xf32>
    %24 = tpu.matmul %21, %22, %cst_13 {dimension_numbers = #tpu.dot_dimension_numbers<[1], [0], [0], [1], [0, 0, 1, 1], [], []>} : vector<16x32xf32>, vector<32x32xf32>, vector<16x32xf32> -> vector<16x32xf32>
    %cst_14 = arith.constant dense<0.000000e+00> : vector<16x32xf32>
    %25 = tpu.matmul %14, %24, %cst_14 {dimension_numbers = #tpu.dot_dimension_numbers<[0], [0], [1], [1], [0, 1, 1, 1], [], []>} : vector<16x16xf32>, vector<16x32xf32>, vector<16x32xf32> -> vector<16x32xf32>
    %26 = vector.broadcast %23 : vector<1x32xf32> to vector<16x32xf32>
    %27 = arith.addf %25, %26 : vector<16x32xf32>
    %c64 = arith.constant 64 : index
    %c0_15 = arith.constant 0 : index
    %28 = vector.load %arg2[%c64, %c0_15] : memref<136x32xf32, #tpu.memory_space<vmem>>, vector<32x32xf32>
    %c130 = arith.constant 130 : index
    %c0_16 = arith.constant 0 : index
    %29 = vector.load %arg2[%c130, %c0_16] : memref<136x32xf32, #tpu.memory_space<vmem>>, vector<1x32xf32>
    %cst_17 = arith.constant dense<0.000000e+00> : vector<16x32xf32>
    %30 = tpu.matmul %27, %28, %cst_17 {dimension_numbers = #tpu.dot_dimension_numbers<[1], [0], [0], [1], [0, 0, 1, 1], [], []>} : vector<16x32xf32>, vector<32x32xf32>, vector<16x32xf32> -> vector<16x32xf32>
    %cst_18 = arith.constant dense<0.000000e+00> : vector<16x32xf32>
    %31 = tpu.matmul %14, %30, %cst_18 {dimension_numbers = #tpu.dot_dimension_numbers<[0], [0], [1], [1], [0, 1, 1, 1], [], []>} : vector<16x16xf32>, vector<16x32xf32>, vector<16x32xf32> -> vector<16x32xf32>
    %32 = vector.broadcast %29 : vector<1x32xf32> to vector<16x32xf32>
    %33 = arith.addf %31, %32 : vector<16x32xf32>
    %c96 = arith.constant 96 : index
    %c0_19 = arith.constant 0 : index
    %34 = vector.load %arg2[%c96, %c0_19] : memref<136x32xf32, #tpu.memory_space<vmem>>, vector<32x32xf32>
    %c131 = arith.constant 131 : index
    %c0_20 = arith.constant 0 : index
    %35 = vector.load %arg2[%c131, %c0_20] : memref<136x32xf32, #tpu.memory_space<vmem>>, vector<1x32xf32>
    %cst_21 = arith.constant dense<0.000000e+00> : vector<16x32xf32>
    %36 = tpu.matmul %33, %34, %cst_21 {dimension_numbers = #tpu.dot_dimension_numbers<[1], [0], [0], [1], [0, 0, 1, 1], [], []>} : vector<16x32xf32>, vector<32x32xf32>, vector<16x32xf32> -> vector<16x32xf32>
    %cst_22 = arith.constant dense<0.000000e+00> : vector<16x32xf32>
    %37 = tpu.matmul %14, %36, %cst_22 {dimension_numbers = #tpu.dot_dimension_numbers<[0], [0], [1], [1], [0, 1, 1, 1], [], []>} : vector<16x16xf32>, vector<16x32xf32>, vector<16x32xf32> -> vector<16x32xf32>
    %38 = vector.broadcast %35 : vector<1x32xf32> to vector<16x32xf32>
    %39 = arith.addf %37, %38 : vector<16x32xf32>
    %c0_23 = arith.constant 0 : index
    %c0_24 = arith.constant 0 : index
    %40 = vector.load %arg3[%c0_23, %c0_24] : memref<16x32xf32, #tpu.memory_space<vmem>>, vector<16x32xf32>
    tpu.vector_store %arg3[%c0_23, %c0_24], %39 {strides = array<i32>} : memref<16x32xf32, #tpu.memory_space<vmem>>, vector<16x32xf32>,
    return
  }
}

</mosaic_0001>

<bundles_post_ra>
// kernel: gnn_model_forward.1
= control target key start
LH: loop header
LB: loop body
LE: loop exit
PB: predicated region body
PF: predicated region fallthrough
CT: control target
= control target key end

     0   :  { %vm17_vm0 = vcmask 130048   ;;  %vm48_vm1 = vcmask 261120   ;;  %s1048_s0 = inlined_call_operand.vmem [shape: f32[16,32], index: 0, kind: input, shape index: {}]   ;;  %s1049_s1 = inlined_call_operand.vmem [shape: f32[16,16], index: 1, kind: input, shape index: {}]   ;;  %s1050_s2 = inlined_call_operand.vmem [shape: f32[136,32], index: 2, kind: input, shape index: {}]   ;;  %s1051_s3 = inlined_call_operand.hbm [shape: f32[16,32], index: 3, kind: output, shape index: {}]  }
   0x1   :  { %v15_v0 = vld [vmem:[%s1049_s1] sm:$0xff]  ;;  %v16_v1 = vld [vmem:[%s1049_s1 + $0x8] sm:$0xff]  ;;  %v46_v2 = vld [vmem:[%s1050_s2 + $0x18] sm:$0xff] }
   0x2   :  { %v18_v3 = vsel %vm17_vm0, %v15_v0, 0.0  ;;  %v21_v4 = vsel %vm17_vm0, %v16_v1, 0.0  ;;  %820 = vmatprep.subr.mxu0 %v46_v2  ;;  %v45_v5 = vld [vmem:[%s1050_s2 + $0x10] sm:$0xff]  ;;  %v44_v7 = vld [vmem:[%s1050_s2 + $0x8] sm:$0xff]  ;;  %v41_v8 = vld [vmem:[%s1048_s0] sm:$0xff] }
   0x3   :  { %19 = vadd.xlane.f32.xlu0 %v18_v3  ;;  %v24_v6 = vadd.f32 %v21_v4, %v18_v3  ;;  %821 = vmatpush3.msra.mxu0 %v46_v2 }
   0x4   :  { %8 = vsyncpa [#allocation3], 0  ;;  %822 = vmatprep.subr.mxu0 %v45_v5  ;;  %828 = vmatprep.mubr.msk.f32.mxu0 %vm48_vm1, %v41_v8  ;;  %v43_v9 = vld [vmem:[%s1050_s2] sm:$0xff]  ;;  %v42_v10 = vld [vmem:[%s1048_s0 + $0x8] sm:$0xff]  ;;  %s924_s29 = smov [#allocation2]  }
   0x5   :  { %823 = vmatpush3.msra.mxu0 %v45_v5  ;;  %v25_v11 = vrot.slane %v24_v6, 4  ;;  %v250_v31 = vld [vmem:[%s1050_s2 + $0x38] sm:$0xff]  ;;  %v249_v34 = vld [vmem:[%s1050_s2 + $0x30] sm:$0xff]  ;;  %v248_v35 = vld [vmem:[%s1050_s2 + $0x28] sm:$0xff]  ;;  %s749_s30 = sshll.u32 %s924_s29, 4  ;;  %s750_s30 = int_to_ptr.vmem [resolvable:$true] %s749_s30 }
   0x6   :  { %824 = vmatprep.subr.mxu0 %v44_v7  ;;  %v247_v36 = vld [vmem:[%s1050_s2 + $0x20] sm:$0xff]  ;;  %v415_v44 = vld [vmem:[%s1050_s2 + $0x58] sm:$0xff]  ;;  %v414_v45 = vld [vmem:[%s1050_s2 + $0x50] sm:$0xff]  ;;  %s902_s4 = scalar_lea.vmem %s750_s30, 256  ;;  %p907_p1 = scmp.lt.s32.totalorder %s750_s30, %s750_s30 }
   0x7   :  { %22 = vadd.xlane.f32.xlu0 %v21_v4  ;;  %825 = vmatpush3.msra.mxu0 %v44_v7  ;;  %v26_v12 = vadd.f32 %v25_v11, %v24_v6  ;;  %v762_v38 = vld [vmem:[%s1050_s2 + $0x80] ss:$0 sm:$0xff]  ;;  %v413_v46 = vld [vmem:[%s1050_s2 + $0x48] sm:$0xff]  ;;  %v767_v49 = vld [vmem:[%s1050_s2 + $0x81] ss:$0 sm:$0xff]  ;;  %p903_p0 = scmp.ne.s32.totalorder %s750_s30, %s902_s4  ;;  %p908_p2 = scmp.lt.s32.totalorder %s902_s4, %s902_s4 }
   0x8   :  { %826 = vmatprep.subr.mxu0 %v43_v9  ;;  %v412_v47 = vld [vmem:[%s1050_s2 + $0x40] sm:$0xff]  ;;  %v580_v55 = vld [vmem:[%s1050_s2 + $0x78] sm:$0xff]  ;;  %v579_v56 = vld [vmem:[%s1050_s2 + $0x70] sm:$0xff] }
   0x9   :  { %827 = vmatpush3.msra.mxu0 %v43_v9  ;;  %v27_v13 = vrot.slane %v26_v12, 2  ;;  %v578_v57 = vld [vmem:[%s1050_s2 + $0x68] sm:$0xff]  ;;  %v577_v58 = vld [vmem:[%s1050_s2 + $0x60] sm:$0xff]  ;;  %p909_p3 = por %p908_p2, %p907_p1 }
   0xa   :  { %829 = vmatmul.mubr.msk.f32.vlgmr.msra.gmra.mxu0 %vm48_vm1, %v42_v10  ;;  %v772_v60 = vld [vmem:[%s1050_s2 + $0x82] ss:$0 sm:$0xff]  ;;  %v777_v2 = vld [vmem:[%s1050_s2 + $0x83] ss:$0 sm:$0xff] }
   0xb   :  { %v28_v14 = vadd.f32 %v27_v13, %v26_v12  ;;  %p910_p4 = pnand %p909_p3, %p903_p0 }
   0xd   :  { %v29_v15 = vrot.slane %v28_v14, 1 }
   0xf   :  { %v30_v16 = vadd.f32 %v29_v15, %v28_v14 }
  0x11   :  { %v35_v17 = vmax.f32 %v30_v16, 1.0 }
  0x13   :  { %896 = vrsqrt.f32 %v35_v17 }
  0x20   :  { %v897_v22 = vpop.eup %896 }
  0x8c   :  { %v20_v18 = vpop.xlane.xlu0 %19 }
  0x8d   :  { %v31_v19 = vmax.f32 %v20_v18, 1.0 }
  0x8f   :  { %898 = vrsqrt.f32 %v31_v19 }
  0x90   :  { %v23_v20 = vpop.xlane.xlu0 %22 }
  0x91   :  { %v32_v21 = vmax.f32 %v23_v20, 1.0 }
  0x93   :  { %900 = vrsqrt.f32 %v32_v21 }
  0x9c   :  { %v899_v23 = vpop.eup %898 }
  0x9d   :  { %v37_v24 = vmul.f32 %v899_v23, %v15_v0 }
  0x9f   :  { %v39_v25 = vmul.f32 %v897_v22, %v37_v24 }
  0xa0   :  { %v901_v26 = vpop.eup %900 }
  0xa1   :  { %134 = vxpose.xlu1.b32.start [1/2] (short) (narrow) %v39_v25, 16  ;;  %v38_v27 = vmul.f32 %v901_v26, %v16_v1 }
  0xa3   :  { %v40_v28 = vmul.f32 %v897_v22, %v38_v27 }
  0xa5   :  { %135 = vxpose.xlu1.b32.end [2/2] (short) (narrow) %v40_v28, 16 }
  0xca   :  { %v830_v29 = vpop.f32.mrf.mxu0 }
  0xcb   :  { %831 = vmatprep.subr.mxu1 %v830_v29 }
  0xcc   :  { %v121_v30 = vpop.f32.mrf.mxu0  ;;  %832 = vmatpush3.msra.mxu1 %v830_v29 }
  0xcd   :  { %833 = vmatprep.subr.mxu1 %v121_v30 }
  0xce   :  { %834 = vmatpush3.msra.mxu1 %v121_v30 }
  0xcf   :  { %838 = vmatprep.subr.mxu1 %v250_v31 }
 0x11d   :  { %v150_v32 = vpop.trf.xlu1 }
 0x11e   :  { %835 = vmatprep.mubr.msk.f32.mxu1 %vm17_vm0, %v150_v32  ;;  %853 = vmatprep.mubr.msk.f32.mxu0 %vm17_vm0, %v150_v32 }
 0x121   :  { %v980_v33 = vpop.trf.xlu1 }
 0x122   :  { %836 = vmatmul.mubr.msk.f32.vlgmr.msra.gmra.mxu1 %vm17_vm0, %v980_v33 }
 0x123   :  { %839 = vmatpush3.msra.mxu1 %v250_v31 }
 0x124   :  { %840 = vmatprep.subr.mxu1 %v249_v34 }
 0x125   :  { %841 = vmatpush3.msra.mxu1 %v249_v34 }
 0x126   :  { %842 = vmatprep.subr.mxu1 %v248_v35 }
 0x127   :  { %843 = vmatpush3.msra.mxu1 %v248_v35 }
 0x128   :  { %844 = vmatprep.subr.mxu1 %v247_v36 }
 0x129   :  { %845 = vmatpush3.msra.mxu1 %v247_v36 }
 0x1e2   :  { %v837_v37 = vpop.f32.mrf.mxu1 }
 0x1e3   :  { %v244_v41 = vadd.f32 %v837_v37, %v762_v38 }
 0x1e4   :  { %v238_v39 = vpop.f32.mrf.mxu1 }
 0x1e5   :  { %v239_v40 = vadd.f32 %v762_v38, %v238_v39 }
 0x1e7   :  { %846 = vmatprep.mubr.msk.f32.mxu1 %vm48_vm1, %v239_v40 }
 0x1e8   :  { %847 = vmatmul.mubr.msk.f32.vlgmr.msra.gmra.mxu1 %vm48_vm1, %v244_v41 }
 0x1e9   :  { %871 = vmatprep.mubr.msk.f32.mxu1 %vm17_vm0, %v150_v32 }
 0x2a8   :  { %v848_v42 = vpop.f32.mrf.mxu1 }
 0x2a9   :  { %849 = vmatprep.subr.mxu0 %v848_v42 }
 0x2aa   :  { %v324_v43 = vpop.f32.mrf.mxu1  ;;  %850 = vmatpush3.msra.mxu0 %v848_v42 }
 0x2ab   :  { %851 = vmatprep.subr.mxu0 %v324_v43 }
 0x2ac   :  { %852 = vmatpush3.msra.mxu0 %v324_v43 }
 0x2ad   :  { %854 = vmatmul.mubr.msk.f32.vlgmr.msra.gmra.mxu0 %vm17_vm0, %v980_v33  ;;  %856 = vmatprep.subr.mxu0 %v415_v44 }
 0x2ae   :  { %857 = vmatpush3.msra.mxu0 %v415_v44 }
 0x2af   :  { %858 = vmatprep.subr.mxu0 %v414_v45 }
 0x2b0   :  { %859 = vmatpush3.msra.mxu0 %v414_v45 }
 0x2b1   :  { %860 = vmatprep.subr.mxu0 %v413_v46 }
 0x2b2   :  { %861 = vmatpush3.msra.mxu0 %v413_v46 }
 0x2b3   :  { %862 = vmatprep.subr.mxu0 %v412_v47 }
 0x2b4   :  { %863 = vmatpush3.msra.mxu0 %v412_v47 }
 0x36d   :  { %v855_v48 = vpop.f32.mrf.mxu0 }
 0x36e   :  { %v409_v52 = vadd.f32 %v855_v48, %v767_v49 }
 0x36f   :  { %v403_v50 = vpop.f32.mrf.mxu0 }
 0x370   :  { %v404_v51 = vadd.f32 %v767_v49, %v403_v50 }
 0x372   :  { %864 = vmatprep.mubr.msk.f32.mxu0 %vm48_vm1, %v404_v51 }
 0x373   :  { %865 = vmatmul.mubr.msk.f32.vlgmr.msra.gmra.mxu0 %vm48_vm1, %v409_v52 }
 0x374   :  { %889 = vmatprep.mubr.msk.f32.mxu0 %vm17_vm0, %v150_v32 }
 0x433   :  { %v866_v53 = vpop.f32.mrf.mxu0 }
 0x434   :  { %867 = vmatprep.subr.mxu1 %v866_v53 }
 0x435   :  { %v489_v54 = vpop.f32.mrf.mxu0  ;;  %868 = vmatpush3.msra.mxu1 %v866_v53 }
 0x436   :  { %869 = vmatprep.subr.mxu1 %v489_v54 }
 0x437   :  { %870 = vmatpush3.msra.mxu1 %v489_v54 }
 0x438   :  { %872 = vmatmul.mubr.msk.f32.vlgmr.msra.gmra.mxu1 %vm17_vm0, %v980_v33  ;;  %874 = vmatprep.subr.mxu1 %v580_v55 }
 0x439   :  { %875 = vmatpush3.msra.mxu1 %v580_v55 }
 0x43a   :  { %876 = vmatprep.subr.mxu1 %v579_v56 }
 0x43b   :  { %877 = vmatpush3.msra.mxu1 %v579_v56 }
 0x43c   :  { %878 = vmatprep.subr.mxu1 %v578_v57 }
 0x43d   :  { %879 = vmatpush3.msra.mxu1 %v578_v57 }
 0x43e   :  { %880 = vmatprep.subr.mxu1 %v577_v58 }
 0x43f   :  { %881 = vmatpush3.msra.mxu1 %v577_v58 }
 0x4f8   :  { %v873_v59 = vpop.f32.mrf.mxu1 }
 0x4f9   :  { %v574_v63 = vadd.f32 %v873_v59, %v772_v60 }
 0x4fa   :  { %v568_v61 = vpop.f32.mrf.mxu1 }
 0x4fb   :  { %v569_v62 = vadd.f32 %v772_v60, %v568_v61 }
 0x4fd   :  { %882 = vmatprep.mubr.msk.f32.mxu1 %vm48_vm1, %v569_v62 }
 0x4fe   :  { %883 = vmatmul.mubr.msk.f32.vlgmr.msra.gmra.mxu1 %vm48_vm1, %v574_v63 }
 0x5be   :  { %v884_v0 = vpop.f32.mrf.mxu1 }
 0x5bf   :  { %885 = vmatprep.subr.mxu0 %v884_v0 }
 0x5c0   :  { %v654_v1 = vpop.f32.mrf.mxu1  ;;  %886 = vmatpush3.msra.mxu0 %v884_v0 }
 0x5c1   :  { %887 = vmatprep.subr.mxu0 %v654_v1 }
 0x5c2   :  { %888 = vmatpush3.msra.mxu0 %v654_v1 }
 0x5c3   :  { %890 = vmatmul.mubr.msk.f32.vlgmr.msra.gmra.mxu0 %vm17_vm0, %v980_v33 }
 0x683   :  { %v891_v3 = vpop.f32.mrf.mxu0 }
 0x684   :  { %v739_v4 = vadd.f32 %v891_v3, %v777_v2 }
 0x685   :  { %v733_v5 = vpop.f32.mrf.mxu0 }
 0x686   :  { %743 = vst.msk [vmem:[#allocation2 + $0x8] sm:$0xff] %vm48_vm1, %v739_v4  ;;  %v734_v6 = vadd.f32 %v777_v2, %v733_v5 }
 0x688   :  { %742 = vst.msk [vmem:[#allocation2] sm:$0xff] %vm48_vm1, %v734_v6 }
 0x689   :  { %913 = shalt.err (!%p910_p4)
}
 0x68a   :  { %s925_s5 = smov 128   ;;  %s926_s2 = smov 8  }
 0x68b   :  { %755 = dma.vmem_to_hbm [thread:$0]  %s750_s30, 256, %s1051_s3, [#allocation3], %s925_s5, %s925_s5, %s926_s2  }
 0x68c   :  { %922 = dma.done.wait [#allocation3], 256  }
 0x68d   :  { %923 = vsyncadd [#allocation3], 4294967040 }
 0x68e   :  { %759 = vsyncpa [#allocation3], 1 }

</bundles_post_ra>
